<compile_context>
chip_gen: v5e
topology: v5e:2x2
jax: 0.10.0
libtpu: 0.0.40
codegen_flags: <defaults>
</compile_context>

<pallas_src>
import jax
import jax.numpy as jnp
from jax import lax
from jax.experimental import pallas as pl
from jax.experimental.pallas import tpu as pltpu


def cam_kernel(gamma_ref, x_ref, o_ref):
    # x_ref / o_ref blocks: (Bt, C, N)
    X = x_ref[...]                                    # native dtype (bf16 fast path on MXU)

    # energy[b, c, d] = sum_n X[b, c, n] * X[b, d, n]  (no materialized X^T)
    energy = lax.dot_general(
        X, X,
        dimension_numbers=(((2,), (2,)), ((0,), (0,))),
        preferred_element_type=jnp.float32,
    )                                                 # (Bt, C, C) f32

    # softmax(rowmax(energy) - energy) == softmax(-energy); stable max of
    # -energy per row is -rowmin(energy).
    row_min = jnp.min(energy, axis=-1, keepdims=True)
    p = jnp.exp(row_min - energy)
    inv_den = pl.reciprocal(jnp.sum(p, axis=-1, keepdims=True), approx=False)
    attention = (p * inv_den).astype(X.dtype)         # (Bt, C, C)

    # out[b, c, n] = sum_d attention[b, c, d] * X[b, d, n]
    out = lax.dot_general(
        attention, X,
        dimension_numbers=(((2,), (1,)), ((0,), (0,))),
        preferred_element_type=jnp.float32,
    )                                                 # (Bt, C, N) f32

    gamma = gamma_ref[0]                              # single SMEM scalar read
    o_ref[...] = (gamma * out + X.astype(jnp.float32)).astype(o_ref.dtype)


def _pick_batch_tile(B, C, N, dtype_bytes, vmem_budget_bytes=12 * 1024 * 1024):
    """Largest divisor of B whose double-buffered footprint fits the budget,
    preferring >= 2 grid steps so v7x's two TensorCores both get work."""

    def fits(bt):
        slab = bt * C * N * dtype_bytes
        temps = 3 * bt * C * C * 4  # energy / p / attention in f32 (approx)
        # 2x double-buffered input slab + 2x double-buffered output slab + temps
        return 4 * slab + temps <= vmem_budget_bytes

    candidates = [d for d in range(1, B + 1) if B % d == 0 and fits(d)]
    if not candidates:
        return 1
    multi_step = [d for d in candidates if B // d >= 2]
    return max(multi_step) if multi_step else max(candidates)


def cam_module_my(x, y, gamma):
    """x, y: (B, C, H, W). gamma: (1,) parameter. Returns (B, C, H, W).

    `y` is accepted for API parity with the PyTorch module but is dead in the
    original forward (energy_y is never used), so it is neither DMA'd nor
    computed on.
    """
    del y  # dead branch in the reference module
    B, C, H, W = x.shape
    N = H * W
    x_flat = x.reshape(B, C, N)

    bt = _pick_batch_tile(B, C, N, x.dtype.itemsize)
    grid_b = B // bt

    out_flat = pl.pallas_call(
        cam_kernel,
        out_shape=jax.ShapeDtypeStruct((B, C, N), x.dtype),
        grid_spec=pltpu.PrefetchScalarGridSpec(
            num_scalar_prefetch=0,
            grid=(grid_b,),
            in_specs=[
                pl.BlockSpec(memory_space=pltpu.SMEM),             # gamma scalar
                pl.BlockSpec((bt, C, N), lambda b: (b, 0, 0)),     # x block
            ],
            out_specs=pl.BlockSpec((bt, C, N), lambda b: (b, 0, 0)),
        ),
        compiler_params=pltpu.CompilerParams(
            dimension_semantics=("parallel",),
            vmem_limit_bytes=48 * 1024 * 1024,
        ),
    )(gamma.astype(jnp.float32), x_flat)

    return out_flat.reshape(B, C, H, W)


if __name__ == "__main__":
    key = jax.random.PRNGKey(0)
    kx, ky = jax.random.split(key)

    B, C, H, W = 2, 8, 16, 16
    x = jax.random.normal(kx, (B, C, H, W), dtype=jnp.float32)
    y = jax.random.normal(ky, (B, C, H, W), dtype=jnp.float32)

    def ref(x, gamma):
        Bv, Cv, Hv, Wv = x.shape
        Xf = x.reshape(Bv, Cv, -1).astype(jnp.float32)
        energy = jnp.einsum("bcn,bdn->bcd", Xf, Xf)
        energy_new = jnp.max(energy, axis=-1, keepdims=True) - energy
        attention = jax.nn.softmax(energy_new, axis=-1)
        o = jnp.einsum("bcd,bdn->bcn", attention, Xf).reshape(Bv, Cv, Hv, Wv)
        return (gamma * o + x).astype(x.dtype)

    # Case 1: gamma = 0 (nn.Parameter(torch.zeros(1)) init) -> out == x.
    gamma0 = jnp.zeros((1,), dtype=jnp.float32)
    out0 = cam_module_my(x, y, gamma0)
    jax.block_until_ready(out0)
    assert jnp.allclose(out0, ref(x, gamma0), atol=1e-5, rtol=1e-5)

    # Case 2: nonzero gamma -> exercises the attention path.
    gamma1 = jnp.full((1,), 0.5, dtype=jnp.float32)
    out1 = cam_module_my(x, y, gamma1)
    jax.block_until_ready(out1)
    assert jnp.allclose(out1, ref(x, gamma1), atol=1e-5, rtol=1e-5)

    print("KERNEL_OK")
</pallas_src>

<mosaic_0001>
module attributes {stable_mosaic.version = 11 : i64} {
  func.func @cam_kernel(%arg0: i32, %arg1: memref<1xf32, #tpu.memory_space<smem>>, %arg2: memref<1x8x256xf32, #tpu.memory_space<vmem>>, %arg3: memref<1x8x256xf32, #tpu.memory_space<vmem>>) attributes {dimension_semantics = [#tpu.dimension_semantics<parallel>], iteration_bounds = array<i64: 2>, scalar_prefetch = 0 : i64, scratch_operands = 0 : i64, tpu.core_type = #tpu.core_type<tc>, window_params = [{transform_indices = @transform_0, window_bounds = array<i64: 1>}, {transform_indices = @transform_1, window_bounds = array<i64: 1, 8, 256>}, {transform_indices = @transform_2, window_bounds = array<i64: 1, 8, 256>}]} {
    %c0 = arith.constant 0 : index
    %c0_0 = arith.constant 0 : index
    %c0_1 = arith.constant 0 : index
    %0 = vector.load %arg2[%c0, %c0_0, %c0_1] : memref<1x8x256xf32, #tpu.memory_space<vmem>>, vector<1x8x256xf32>
    %cst = arith.constant dense<0.000000e+00> : vector<1x8x8xf32>
    %1 = tpu.matmul %0, %0, %cst {dimension_numbers = #tpu.dot_dimension_numbers<[2], [2], [1], [1], [0, 0, 0, 1, 1, 1], [0], [0]>} : vector<1x8x256xf32>, vector<1x8x256xf32>, vector<1x8x8xf32> -> vector<1x8x8xf32>
    %cst_2 = arith.constant dense<0x7F800000> : vector<1x8xf32>
    %2 = vector.multi_reduction <minimumf>, %1, %cst_2 [2] : vector<1x8x8xf32> to vector<1x8xf32>
    %3 = vector.shape_cast %2 : vector<1x8xf32> to vector<1x8x1xf32>
    %4 = vector.broadcast %3 : vector<1x8x1xf32> to vector<1x8x8xf32>
    %5 = arith.subf %4, %1 : vector<1x8x8xf32>
    %6 = math.exp %5 : vector<1x8x8xf32>
    %cst_3 = arith.constant dense<0.000000e+00> : vector<1x8xf32>
    %7 = vector.multi_reduction <add>, %6, %cst_3 [2] : vector<1x8x8xf32> to vector<1x8xf32>
    %8 = vector.shape_cast %7 : vector<1x8xf32> to vector<1x8x1xf32>
    %9 = tpu.reciprocal %8 : vector<1x8x1xf32> -> vector<1x8x1xf32>
    %10 = vector.broadcast %9 : vector<1x8x1xf32> to vector<1x8x8xf32>
    %11 = arith.mulf %6, %10 : vector<1x8x8xf32>
    %cst_4 = arith.constant dense<0.000000e+00> : vector<1x8x256xf32>
    %12 = tpu.matmul %11, %0, %cst_4 {dimension_numbers = #tpu.dot_dimension_numbers<[2], [1], [1], [2], [0, 0, 0, 1, 1, 2], [0], [0]>} : vector<1x8x8xf32>, vector<1x8x256xf32>, vector<1x8x256xf32> -> vector<1x8x256xf32>
    %c0_5 = arith.constant 0 : index
    %13 = memref.load %arg1[%c0_5] : memref<1xf32, #tpu.memory_space<smem>>
    %14 = vector.broadcast %13 : f32 to vector<1x8x256xf32>
    %15 = arith.mulf %14, %12 : vector<1x8x256xf32>
    %16 = arith.addf %15, %0 : vector<1x8x256xf32>
    %c0_6 = arith.constant 0 : index
    %c0_7 = arith.constant 0 : index
    %c0_8 = arith.constant 0 : index
    %17 = vector.load %arg3[%c0_6, %c0_7, %c0_8] : memref<1x8x256xf32, #tpu.memory_space<vmem>>, vector<1x8x256xf32>
    tpu.vector_store %arg3[%c0_6, %c0_7, %c0_8], %16 {strides = array<i32>} : memref<1x8x256xf32, #tpu.memory_space<vmem>>, vector<1x8x256xf32>,
    return
  }
  func.func @transform_0(%arg0: i32) -> i32 {
    %c0_i32 = arith.constant 0 : i32
    %c0_i32_0 = arith.constant 0 : i32
    return %c0_i32 : i32
  }
  func.func @transform_1(%arg0: i32) -> (i32, i32, i32) {
    %c0_i32 = arith.constant 0 : i32
    %c0_i32_0 = arith.constant 0 : i32
    %c0_i32_1 = arith.constant 0 : i32
    return %arg0, %c0_i32, %c0_i32_0 : i32, i32, i32
  }
  func.func @transform_2(%arg0: i32) -> (i32, i32, i32) {
    %c0_i32 = arith.constant 0 : i32
    %c0_i32_0 = arith.constant 0 : i32
    %c0_i32_1 = arith.constant 0 : i32
    return %arg0, %c0_i32, %c0_i32_0 : i32, i32, i32
  }
}

</mosaic_0001>

<bundles_post_ra>
// kernel: tpu_custom_call.1
= control target key start
LH: loop header
LB: loop body
LE: loop exit
PB: predicated region body
PF: predicated region fallthrough
CT: control target
= control target key end

     0   :  { %s687_s0 = inlined_call_operand.<no memory space> [shape: f32[1], index: 0, kind: input, shape index: {}]   ;;  %s688_s1 = inlined_call_operand.hbm [shape: f32[2,8,256], index: 1, kind: input, shape index: {}]   ;;  %s689_s2 = inlined_call_operand.hbm [shape: f32[2,8,256], index: 2, kind: output, shape index: {}]  }
   0x1   :  { %7 = sst [smem:[#allocation2]] %s687_s0 }
   0x2   :  { %8 = vsyncpa [#allocation4], 0 }
   0x3   :  { %10 = vsyncpa [#allocation4 + $0x1], 0 }
   0x4   :  { %11 = vsyncpa [#allocation5], 0 }
   0x5   :  { %13 = vsyncpa [#allocation5 + $0x1], 0  ;;  %s552_s11 = smov 0   ;;  %s554_s12 = smov 0  }
   0x6   :  { %s556_s13 = smov 0   ;;  %s558_s14 = smov 0  }
   0x7 LB: > { %s573_s0 = sadd.s32 4294967295, %s532_s14   ;;  %s368_s15 = sadd.s32 4294967294, %s532_s14   ;;  %s532_s14 = sphi %s558_s14, %s699_s14   ;;  %s528_s13 = sphi %s556_s13, %s698_s13   ;;  %s524_s12 = sphi %s554_s12, %s697_s12   ;;  %s520_s11 = sphi %s552_s11, %s696_s11  }
   0x8   : > { %s577_s16 = sadd.s32 1, %s532_s14   ;;  %s47_s17 = sadd.s32 1, %s528_s13 }
   0x9   : > { %s44_s18 = ssub.s32 %s532_s14, %s577_s16  ;;  %p54_p0 = scmp.ne.s32.totalorder %s528_s13, %s524_s12 }
   0xa   : > { %p45_p1 = scmp.eq.s32.totalorder %s44_s18, 0  ;;  %p55_p2 = scmp.eq.s32.totalorder %s532_s14, 0 }
   0xb   : > { %p60_p3 = scmp.ne.s32.totalorder %s524_s12, %s520_s11  ;;  %p61_p4 = scmp.eq.s32.totalorder %s573_s0, 0 }
   0xc   : > { %s589_s19 = scalar_select %p45_p1, %s528_s13, %s47_s17  }
   0xd   : > { %p591_p5 = por %p55_p2, %p54_p0  ;;  %p595_p6 = por %p61_p4, %p60_p3 }
   0xe   : > { %p84_p7 = scmp.eq.s32.totalorder %s573_s0, 1  ;;  %p90_p8 = scmp.eq.s32.totalorder %s368_s15, 1 }
   0xf   : > { %p398_p10 = scmp.lt.s32.totalorder %s532_s14, 2  ;;  %s113_s24 = sand.u32 1, %s528_s13  }
  0x10   : > { %p602_p11 = por %p84_p7, %p54_p0  ;;  %p606_p12 = por %p90_p8, %p60_p3 }
  0x11   : > { %s384_s25 = sshll.u32 %s532_s14, 4  ;;  %s371_s26 = sshll.u32 %s113_s24, 4 }
  0x12   : > { %s122_s29 = scalar_lea.hbm %s688_s1, %s384_s25  ;;  %s117_s3 = scalar_lea.vmem [#allocation3], %s371_s26 }
  0x13   : > { %s124_s30 = sshll.u32 %s122_s29, 4  ;;  %s126_s4 = sshll.u32 %s117_s3, 4  ;;  %s125_s30 = int_to_ptr.hbm [resolvable:$true] %s124_s30  ;;  %s127_s4 = int_to_ptr.vmem [resolvable:$true] %s126_s4 }
  0x14   : > { %p617_p13 = pnand %p398_p10, %p591_p5  ;;  %p374_p0 = scmp.ge.s32.totalorder %s532_s14, 1 }
  0x15   : > { %p131_p1 = scmp.lt.s32.totalorder %s532_s14, 3  ;;  %s114_s6 = scalar_lea.sflag [#allocation4], %s113_s24 }
  0x16   : > { %s436_s7 = sshra.s32 %s125_s30, 4  ;;  %p440_p3 = pneg %p617_p13  ;;  %s437_s7 = int_to_ptr.hbm [resolvable:$true] %s436_s7 }
  0x17   : > { %s438_s8 = scalar_lea.hbm %s437_s7, 16  ;;  %s443_s15 = scalar_lea.hbm %s688_s1, 32 }
  0x18   : > { %p439_p2 = scmp.ne.s32.totalorder %s437_s7, %s438_s8  ;;  %p444_p5 = scmp.lt.s32.totalorder %s437_s7, %s688_s1 }
  0x19   : > { %p445_p8 = scmp.lt.s32.totalorder %s443_s15, %s438_s8 }
  0x1a   : > { %p441_p4 = pnand %p440_p3, %p439_p2 }
  0x1b   : > { %p446_p10 = por %p445_p8, %p444_p5 }
  0x1c   : > { %p442_p7 = pneg %p441_p4 }
  0x1e   : > { %p447_p9 = pnand %p446_p10, %p442_p7 }
  0x20   : > { %450 = shalt.err (!%p447_p9)
}
  0x21   : > { %393 = dma.hbm_to_vmem [thread:$0]  (!%p617_p13), %s125_s30, 256, %s127_s4, %s114_s6  }
  0x22   : > { %p132_p2 = pnand %p374_p0, %p131_p1 }
  0x23   : > { %s638_s20 = sand.u32 (!%p132_p2), 1, %s524_s12  }
  0x24   : > { %135 = sbr.rel (%p132_p2) target bundleno = 578 (0x242), region = 28  ;;  %s375_s24 = sshll.u32 (!%p132_p2), %s638_s20, 4 }
  0x25   : > { %s138_s25 = scalar_lea.sflag (!%p132_p2), [#allocation4], %s638_s20  ;;  %s141_s26 = scalar_lea.vmem (!%p132_p2), [#allocation3], %s375_s24 }
  0x29   : > { %511 = dma.done.wait (%p595_p6), %s138_s25, 256  }
  0x2a   : > { %513 = vsyncadd (%p595_p6), %s138_s25, 4294967040  ;;  %v163_v0 = vld [vmem:[%s141_s26] sm:$0xff]  ;;  %v164_v1 = vld [vmem:[%s141_s26 + $0x8] sm:$0xff]  ;;  %vm205_vm0 = vcmask 64512   ;;  %s273_s21 = sld [smem:[#allocation2]]  ;;  %s385_s27 = sshll.u32 %s573_s0, 4 }
  0x2b   : > { %180 = vmatpush.xpose.msra.mxu0 %v163_v0  ;;  %200 = vmatpush.xpose.msra.mxu1 %v164_v1  ;;  %s293_s30 = scalar_lea.hbm %s689_s2, %s385_s27  ;;  %s162_s3 = scalar_lea.vmem [#allocation6], %s375_s24 }
  0x2c   : > { %248 = vmatpush.msra.mxu2 %v163_v0  ;;  %268 = vmatpush.msra.mxu3 %v164_v1  ;;  %s295_s4 = sshll.u32 %s162_s3, 4  ;;  %s297_s5 = sshll.u32 %s293_s30, 4  ;;  %s296_s4 = int_to_ptr.vmem [resolvable:$true] %s295_s4  ;;  %s298_s5 = int_to_ptr.hbm [resolvable:$true] %s297_s5 }
  0x2d   : > { %s282_s0 = scalar_lea.sflag [#allocation5], %s638_s20  ;;  %s480_s6 = sshra.s32 %s298_s5, 4  ;;  %s481_s6 = int_to_ptr.hbm [resolvable:$true] %s480_s6 }
  0x2e   : > { %181 = vmatmul.f32.vlgmr.msra.gmra.mxu0 %v163_v0  ;;  %201 = vmatmul.f32.vlgmr.msra.gmra.mxu1 %v164_v1  ;;  %s482_s7 = scalar_lea.hbm %s481_s6, 16  ;;  %s486_s10 = scalar_lea.hbm %s689_s2, 32 }
  0x2f   : > { %p483_p6 = scmp.ne.s32.totalorder %s481_s6, %s482_s7  ;;  %p487_p0 = scmp.lt.s32.totalorder %s481_s6, %s689_s2 }
  0x30   : > { %v274_v23 = vstv %s273_s21  ;;  %p488_p1 = scmp.lt.s32.totalorder %s486_s10, %s482_s7 }
  0x31   : > { %p484_p9 = pnand %p483_p6, %p602_p11 }
  0x32   : > { %p489_p3 = por %p488_p1, %p487_p0 }
  0x33   : > { %p485_p13 = pneg %p484_p9 }
  0x35   : > { %p490_p4 = pnand %p489_p3, %p485_p13 }
  0xab   : > { %v182_v2 = vpop.f32.mrf.mxu0  ;;  %v202_v3 = vpop.f32.mrf.mxu1 }
  0xac   : > { %v203_v4 = vadd.f32 %v202_v3, %v182_v2 }
  0xae   : > { %v206_v5 = vsel %vm205_vm0, %v203_v4, inf }
  0xaf   : > { %207 = vmin.xlane.f32.xlu0 %v206_v5 }
 0x122   : > { %v208_v6 = vpop.xlane.xlu0 %207 }
 0x123   : > { %v209_v7 = vsub.f32 %v208_v6, %v203_v4 }
 0x125   : > { %v210_v8 = vmul.f32 1.442695, %v209_v7 }
 0x127   : > { %432 = vpow2.f32 %v210_v8 }
 0x12d   : > { %v433_v9 = vpop.eup %432 }
 0x12e   : > { %v212_v10 = vsel %vm205_vm0, %v433_v9, 0.0 }
 0x12f   : > { %213 = vadd.xlane.f32.xlu0 %v212_v10 }
 0x1a2   : > { %v214_v11 = vpop.xlane.xlu0 %213 }
 0x1a3   : > { %434 = vrcp.f32 %v214_v11  ;;  %v226_v15 = vand.u32 2147483648, %v214_v11  ;;  %v224_v17 = vand.u32 2147483647, %v214_v11  ;;  %vm220_vm2 = vweird.f32 %v214_v11 }
 0x1a5   : > { %v227_v19 = vor.u32 1.1754944e-38, %v226_v15  ;;  %vm225_vm4 = vcmp.eq.f32.partialorder %v224_v17, 8.507059e+37 }
 0x1a9   : > { %v435_v12 = vpop.eup %434 }
 0x1aa   : > { %v216_v13 = vmul.f32 %v435_v12, %v214_v11  ;;  %vm221_vm1 = vweird.f32 %v435_v12 }
 0x1ab   : > { %vm222_vm3 = vmor %vm220_vm2, %vm221_vm1 }
 0x1ac   : > { %v217_v14 = vsub.f32 1.0, %v216_v13 }
 0x1ae   : > { %v218_v16 = vmul.f32 %v435_v12, %v217_v14 }
 0x1b0   : > { %v219_v18 = vadd.f32 %v435_v12, %v218_v16 }
 0x1b2   : > { %v223_v20 = vsel %vm222_vm3, %v435_v12, %v219_v18 }
 0x1b3   : > { %v228_v21 = vsel %vm225_vm4, %v227_v19, %v223_v20 }
 0x1b4   : > { %v229_v22 = vmul.f32 %v433_v9, %v228_v21 }
 0x1b6   : > { %377 = vmatmul.msk.f32.vlgmr.msra.gmra.mxu2 %vm205_vm0, %v229_v22  ;;  %378 = vmatmul.msk.f32.vlgmr.msra.gmra.mxu3 %vm205_vm0, %v229_v22 }
 0x239   : > { %v250_v24 = vpop.f32.mrf.mxu2  ;;  %v270_v25 = vpop.f32.mrf.mxu3 }
 0x23a   : > { %v275_v26 = vmul.f32 %v274_v23, %v250_v24  ;;  %v276_v27 = vmul.f32 %v274_v23, %v270_v25 }
 0x23c   : > { %v277_v28 = vadd.f32 %v275_v26, %v163_v0  ;;  %v278_v29 = vadd.f32 %v276_v27, %v164_v1 }
 0x23e   : > { %279 = vst [vmem:[%s162_s3] sm:$0xff] %v277_v28 }
 0x23f   : > { %280 = vst [vmem:[%s162_s3 + $0x8] sm:$0xff] %v278_v29 }
 0x240   : > { %493 = shalt.err (!%p490_p4)
}
 0x241   : > { %388 = dma.vmem_to_hbm [thread:$0]  (%p602_p11), %s296_s4, 256, %s298_s5, %s282_s0  }
 0x242 PF: > { %s309_s18 = sand.u32 1, %s520_s11   ;;  %p695_p7 = scmp.ge.s32.totalorder %s532_s14, 2 }
 0x243   : > { %s310_s20 = scalar_lea.sflag [#allocation5], %s309_s18 }
 0x244   : > { %p395_p5 = pnand %p695_p7, %p606_p12 }
 0x246   : > { %p396_p8 = pneg %p395_p5 }
 0x248   : > { %515 = dma.done.wait (%p396_p8), %s310_s20, 256  }
 0x249   : > { %517 = vsyncadd (%p396_p8), %s310_s20, 4294967040  ;;  %p16_p10 = scmp.ge.s32.totalorder %s577_s16, 4   ;;  %s696_s11 = smov %s524_s12 }
 0x24a   : > { %s697_s12 = smov %s528_s13  ;;  %s698_s13 = smov %s589_s19 }
 0x24b   : > { %s699_s14 = smov %s577_s16  ;;  %18 = sbr.rel (!%p16_p10) target bundleno = 7 (0x7), region = 73 }
 0x250   :  { %316 = vsyncpa [#allocation4], 1 }
 0x251   :  { %318 = vsyncpa [#allocation4 + $0x1], 1 }
 0x252   :  { %319 = vsyncpa [#allocation5], 1 }
 0x253   :  { %321 = vsyncpa [#allocation5 + $0x1], 1 }

</bundles_post_ra>
